<compile_context>
chip_gen: v5e
topology: v5e:2x2
jax: 0.10.0
libtpu: 0.0.40
codegen_flags: <defaults>
</compile_context>

<pallas_src>
import jax
import jax.numpy as jnp
from jax import lax
from jax.experimental import pallas as pl
from jax.experimental.pallas import tpu as pltpu

LANE = 128
SUBLANE_BF16 = 16          # bf16 packs 16 sublanes per vreg


def _round_up(n, m):
    return ((n + m - 1) // m) * m


def _pad_to(x, shape):
    pads = [(0, s - d) for d, s in zip(x.shape, shape)]
    return jnp.pad(x, pads)


def rnn_kernel(ids_ref, emb_ref, wx_ref, b_ref, wh_ref, wc_ref, bc_ref, out_ref):
    # ids_ref: (T*Bp, 1) int32, time-major (row j*Bp + b == token batch[b, j])
    # emb_ref: (Vp, Np) bf16   wx_ref: (Np, Hp) bf16   b_ref: (1, Hp) f32
    # wh_ref:  (Hp, Hp) bf16   wc_ref: (Hp, Cp) bf16   bc_ref: (1, Cp) f32
    # out_ref: (Bp, Cp) f32
    TB = ids_ref.shape[0]
    Vp = emb_ref.shape[0]
    Hp = wx_ref.shape[1]
    Bp = out_ref.shape[0]
    T = TB // Bp

    # ---- hoisted input path (bulk MXU work, off the serial recurrence) ----
    # One-hot embedding gather on the MXU (exact row selection; ids are
    # clamped in the wrapper so this matches jnp.take).
    # TODO(synk): replace with a scalar-prefetch DMA row gather (ids in SMEM
    # via PrefetchScalarGridSpec, HBM-resident table + pl.Element row spec)
    # once vocab grows past a few hundred rows; the one-hot matmul is
    # O(T*B*V*n_in) MACs of which only 1/V are useful.
    ids = ids_ref[...]                                           # (TB, 1)
    tok_iota = lax.broadcasted_iota(jnp.int32, (TB, Vp), 1)
    onehot = jnp.where(tok_iota == ids, 1.0, 0.0).astype(emb_ref.dtype)
    x = jnp.dot(onehot, emb_ref[...],
                preferred_element_type=jnp.float32)              # (TB, Np)
    # Input projection for ALL timesteps at once + fused bias (bx + bh), kept
    # LIVE in vregs (TB x Hp f32 = 16 vregs here) -- no VMEM scratch
    # round-trip on the serial dependency chain.
    a = (jnp.dot(x.astype(wx_ref.dtype), wx_ref[...],
                 preferred_element_type=jnp.float32)
         + b_ref[...])                                           # (TB, Hp) f32

    # ---- serial recurrence: h = tanh(A[j] + h @ Wh), fully unrolled ----
    # NOTE: h is re-quantized to bf16 for each MXU step; rounding drift vs the
    # f32 reference is well within tolerance at T=8 (document for long T).
    # TODO(synk): hold Wh weight-stationary across the unrolled loop with
    # pltpu.matmul_push_rhs / matmul_acc_lhs / matmul_pop to drop the per-step
    # RHS load from the MXU critical path.
    # TODO(synk): for large T switch to lax.fori_loop(..., unroll=4-8) over a
    # VMEM A scratch (pl.multiple_of row offsets) to bound vreg pressure.
    wh = wh_ref[...]                       # hoisted load, stays resident
    h = jnp.zeros((Bp, Hp), jnp.float32)
    for j in range(T):                     # T is static -> fully unrolled
        r = jnp.dot(h.astype(wh.dtype), wh,
                    preferred_element_type=jnp.float32)
        a_j = a[j * Bp:(j + 1) * Bp, :]    # static, vreg-aligned slice
        h = jnp.tanh(a_j + r)

    # ---- classifier (lane-dense padded output, sliced to (B, 2) on host) ----
    out_ref[...] = (jnp.dot(h.astype(wc_ref.dtype), wc_ref[...],
                            preferred_element_type=jnp.float32)
                    + bc_ref[...]).astype(out_ref.dtype)


def rnn_forward(batch, emb_table, wx, bx, wh, bh, wc, bc):
    """batch: (B, T) int32 tokens -> (B, 2) f32 logits."""
    B, T = batch.shape
    V, n_in = emb_table.shape
    H = wx.shape[1]
    C = wc.shape[1]

    Vp = _round_up(V, LANE)
    Np = _round_up(n_in, LANE)
    Hp = _round_up(H, LANE)        # keep exactly 128-wide for v5e MXU passes
    Cp = _round_up(C, LANE)
    # bf16 packs 16 sublanes/vreg: pad the matmul LHS row count (batch) to 16
    # so the per-step h operand is sublane-dense on v6e.
    Bp = _round_up(B, SUBLANE_BF16)

    # Clamp ids like jnp.take (the one-hot gather would silently zero
    # out-of-range tokens otherwise); pad extra batch rows with token 0.
    ids2d = _pad_to(jnp.clip(batch.astype(jnp.int32), 0, V - 1), (Bp, T))
    # Time-major flattened token ids (tiny int op; no activation slab on host).
    ids = jnp.transpose(ids2d, (1, 0)).reshape(T * Bp, 1)

    # Zero-padded bf16 MXU operands; biases fused / kept f32 (v5e has no bf16
    # VPU/EUP so the elementwise chain stays f32).
    emb_p = _pad_to(emb_table, (Vp, Np)).astype(jnp.bfloat16)
    wx_p = _pad_to(wx, (Np, Hp)).astype(jnp.bfloat16)
    b_p = _pad_to(bx + bh, (1, Hp)).astype(jnp.float32)
    wh_p = _pad_to(wh, (Hp, Hp)).astype(jnp.bfloat16)
    wc_p = _pad_to(wc, (Hp, Cp)).astype(jnp.bfloat16)
    bc_p = _pad_to(bc, (1, Cp)).astype(jnp.float32)

    vmem = pltpu.MemorySpace.VMEM
    out_p = pl.pallas_call(
        rnn_kernel,
        out_shape=jax.ShapeDtypeStruct((Bp, Cp), jnp.float32),
        in_specs=[pl.BlockSpec(memory_space=vmem)] * 7,
        out_specs=pl.BlockSpec(memory_space=vmem),
        compiler_params=pltpu.CompilerParams(
            vmem_limit_bytes=16 * 1024 * 1024),   # explicit, v7x-safe
    )(ids, emb_p, wx_p, b_p, wh_p, wc_p, bc_p)
    # TODO(synk): scaling path for large B/T/V (esp. v7x's 64 MiB VMEM and
    # 2 TCs): grid over T with a BlockSpec-tiled A scratch, embedding table in
    # HBM (memory_space=pl.ANY) with a DMA gather, and a "parallel" batch-block
    # grid axis so each TensorCore runs an independent recurrence.
    return out_p[:B, :C]


def rnn_reference(batch, emb_table, wx, bx, wh, bh, wc, bc):
    """Pure-JAX f32 reference matching the PyTorch forward."""
    B, T = batch.shape
    emb = jnp.take(emb_table, batch, axis=0)          # (B, T, n_in)
    h = jnp.zeros((B, wh.shape[0]), jnp.float32)
    for j in range(T):
        h = jnp.tanh(emb[:, j] @ wx + bx + h @ wh + bh)
    return h @ wc + bc


def init_params(key, vocab_size, n_in, hidden_size):
    ks = jax.random.split(key, 7)
    scale = 0.1
    emb_table = scale * jax.random.normal(ks[0], (vocab_size, n_in), jnp.float32)
    # padding_idx=0 -> zero embedding row 0
    emb_table = emb_table.at[0].set(0.0)
    # "input-major" (in_dim, out_dim) weights so the kernel does x @ W + b
    wx = scale * jax.random.normal(ks[1], (n_in, hidden_size), jnp.float32)
    bx = scale * jax.random.normal(ks[2], (1, hidden_size), jnp.float32)
    wh = scale * jax.random.normal(ks[3], (hidden_size, hidden_size), jnp.float32)
    bh = scale * jax.random.normal(ks[4], (1, hidden_size), jnp.float32)
    wc = scale * jax.random.normal(ks[5], (hidden_size, 2), jnp.float32)
    bc = scale * jax.random.normal(ks[6], (1, 2), jnp.float32)
    return emb_table, wx, bx, wh, bh, wc, bc


if __name__ == "__main__":
    B, T = 8, 8
    vocab_size, n_in, hidden_size = 50, 16, 32

    key = jax.random.PRNGKey(0)
    pkey, dkey = jax.random.split(key)
    params = init_params(pkey, vocab_size, n_in, hidden_size)

    batch = jax.random.randint(dkey, (B, T), 0, vocab_size, dtype=jnp.int32)

    out = rnn_forward(batch, *params)
    out = jax.block_until_ready(out)
    assert out.shape == (B, 2) and out.dtype == jnp.float32

    ref = rnn_reference(batch, *params)
    max_err = float(jnp.max(jnp.abs(out - ref)))
    assert max_err < 5e-2, f"max abs error vs reference: {max_err}"

    print("KERNEL_OK")
</pallas_src>

<mosaic_0001>
module attributes {stable_mosaic.version = 11 : i64} {
  func.func @rnn_kernel(%arg0: memref<128x1xi32, #tpu.memory_space<vmem>>, %arg1: memref<128x128xbf16, #tpu.memory_space<vmem>>, %arg2: memref<128x128xbf16, #tpu.memory_space<vmem>>, %arg3: memref<1x128xf32, #tpu.memory_space<vmem>>, %arg4: memref<128x128xbf16, #tpu.memory_space<vmem>>, %arg5: memref<128x128xbf16, #tpu.memory_space<vmem>>, %arg6: memref<1x128xf32, #tpu.memory_space<vmem>>, %arg7: memref<16x128xf32, #tpu.memory_space<vmem>>) attributes {dimension_semantics = [], scalar_prefetch = 0 : i64, scratch_operands = 0 : i64, tpu.core_type = #tpu.core_type<tc>} {
    %c0 = arith.constant 0 : index
    %c0_0 = arith.constant 0 : index
    %0 = vector.load %arg0[%c0, %c0_0] : memref<128x1xi32, #tpu.memory_space<vmem>>, vector<128x1xi32>
    %1 = tpu.iota {dimensions = array<i32: 1>} : vector<128x128xi32>
    %2 = vector.broadcast %0 : vector<128x1xi32> to vector<128x128xi32>
    %3 = arith.cmpi eq, %1, %2 : vector<128x128xi32>
    %cst = arith.constant 1.000000e+00 : f32
    %cst_1 = arith.constant 0.000000e+00 : f32
    %4 = vector.broadcast %cst : f32 to vector<128x128xf32>
    %5 = vector.broadcast %cst_1 : f32 to vector<128x128xf32>
    %6 = arith.select %3, %4, %5 : vector<128x128xi1>, vector<128x128xf32>
    %7 = arith.truncf %6 : vector<128x128xf32> to vector<128x128xbf16>
    %c0_2 = arith.constant 0 : index
    %c0_3 = arith.constant 0 : index
    %8 = vector.load %arg1[%c0_2, %c0_3] : memref<128x128xbf16, #tpu.memory_space<vmem>>, vector<128x128xbf16>
    %cst_4 = arith.constant dense<0.000000e+00> : vector<128x128xf32>
    %9 = tpu.matmul %7, %8, %cst_4 {dimension_numbers = #tpu.dot_dimension_numbers<[1], [0], [0], [1], [0, 0, 1, 1], [], []>} : vector<128x128xbf16>, vector<128x128xbf16>, vector<128x128xf32> -> vector<128x128xf32>
    %10 = arith.truncf %9 : vector<128x128xf32> to vector<128x128xbf16>
    %c0_5 = arith.constant 0 : index
    %c0_6 = arith.constant 0 : index
    %11 = vector.load %arg2[%c0_5, %c0_6] : memref<128x128xbf16, #tpu.memory_space<vmem>>, vector<128x128xbf16>
    %cst_7 = arith.constant dense<0.000000e+00> : vector<128x128xf32>
    %12 = tpu.matmul %10, %11, %cst_7 {dimension_numbers = #tpu.dot_dimension_numbers<[1], [0], [0], [1], [0, 0, 1, 1], [], []>} : vector<128x128xbf16>, vector<128x128xbf16>, vector<128x128xf32> -> vector<128x128xf32>
    %c0_8 = arith.constant 0 : index
    %c0_9 = arith.constant 0 : index
    %13 = vector.load %arg3[%c0_8, %c0_9] : memref<1x128xf32, #tpu.memory_space<vmem>>, vector<1x128xf32>
    %14 = vector.broadcast %13 : vector<1x128xf32> to vector<128x128xf32>
    %15 = arith.addf %12, %14 : vector<128x128xf32>
    %c0_10 = arith.constant 0 : index
    %c0_11 = arith.constant 0 : index
    %16 = vector.load %arg4[%c0_10, %c0_11] : memref<128x128xbf16, #tpu.memory_space<vmem>>, vector<128x128xbf16>
    %cst_12 = arith.constant 0.000000e+00 : f32
    %17 = vector.broadcast %cst_12 : f32 to vector<16x128xf32>
    %18 = arith.truncf %17 : vector<16x128xf32> to vector<16x128xbf16>
    %cst_13 = arith.constant dense<0.000000e+00> : vector<16x128xf32>
    %19 = tpu.matmul %18, %16, %cst_13 {dimension_numbers = #tpu.dot_dimension_numbers<[1], [0], [0], [1], [0, 0, 1, 1], [], []>} : vector<16x128xbf16>, vector<128x128xbf16>, vector<16x128xf32> -> vector<16x128xf32>
    %20 = vector.extract_strided_slice %15 {offsets = [0, 0], sizes = [16, 128], strides = [1, 1]} : vector<128x128xf32> to vector<16x128xf32>
    %21 = arith.addf %20, %19 : vector<16x128xf32>
    %22 = math.tanh %21 : vector<16x128xf32>
    %23 = arith.truncf %22 : vector<16x128xf32> to vector<16x128xbf16>
    %cst_14 = arith.constant dense<0.000000e+00> : vector<16x128xf32>
    %24 = tpu.matmul %23, %16, %cst_14 {dimension_numbers = #tpu.dot_dimension_numbers<[1], [0], [0], [1], [0, 0, 1, 1], [], []>} : vector<16x128xbf16>, vector<128x128xbf16>, vector<16x128xf32> -> vector<16x128xf32>
    %25 = vector.extract_strided_slice %15 {offsets = [16, 0], sizes = [16, 128], strides = [1, 1]} : vector<128x128xf32> to vector<16x128xf32>
    %26 = arith.addf %25, %24 : vector<16x128xf32>
    %27 = math.tanh %26 : vector<16x128xf32>
    %28 = arith.truncf %27 : vector<16x128xf32> to vector<16x128xbf16>
    %cst_15 = arith.constant dense<0.000000e+00> : vector<16x128xf32>
    %29 = tpu.matmul %28, %16, %cst_15 {dimension_numbers = #tpu.dot_dimension_numbers<[1], [0], [0], [1], [0, 0, 1, 1], [], []>} : vector<16x128xbf16>, vector<128x128xbf16>, vector<16x128xf32> -> vector<16x128xf32>
    %30 = vector.extract_strided_slice %15 {offsets = [32, 0], sizes = [16, 128], strides = [1, 1]} : vector<128x128xf32> to vector<16x128xf32>
    %31 = arith.addf %30, %29 : vector<16x128xf32>
    %32 = math.tanh %31 : vector<16x128xf32>
    %33 = arith.truncf %32 : vector<16x128xf32> to vector<16x128xbf16>
    %cst_16 = arith.constant dense<0.000000e+00> : vector<16x128xf32>
    %34 = tpu.matmul %33, %16, %cst_16 {dimension_numbers = #tpu.dot_dimension_numbers<[1], [0], [0], [1], [0, 0, 1, 1], [], []>} : vector<16x128xbf16>, vector<128x128xbf16>, vector<16x128xf32> -> vector<16x128xf32>
    %35 = vector.extract_strided_slice %15 {offsets = [48, 0], sizes = [16, 128], strides = [1, 1]} : vector<128x128xf32> to vector<16x128xf32>
    %36 = arith.addf %35, %34 : vector<16x128xf32>
    %37 = math.tanh %36 : vector<16x128xf32>
    %38 = arith.truncf %37 : vector<16x128xf32> to vector<16x128xbf16>
    %cst_17 = arith.constant dense<0.000000e+00> : vector<16x128xf32>
    %39 = tpu.matmul %38, %16, %cst_17 {dimension_numbers = #tpu.dot_dimension_numbers<[1], [0], [0], [1], [0, 0, 1, 1], [], []>} : vector<16x128xbf16>, vector<128x128xbf16>, vector<16x128xf32> -> vector<16x128xf32>
    %40 = vector.extract_strided_slice %15 {offsets = [64, 0], sizes = [16, 128], strides = [1, 1]} : vector<128x128xf32> to vector<16x128xf32>
    %41 = arith.addf %40, %39 : vector<16x128xf32>
    %42 = math.tanh %41 : vector<16x128xf32>
    %43 = arith.truncf %42 : vector<16x128xf32> to vector<16x128xbf16>
    %cst_18 = arith.constant dense<0.000000e+00> : vector<16x128xf32>
    %44 = tpu.matmul %43, %16, %cst_18 {dimension_numbers = #tpu.dot_dimension_numbers<[1], [0], [0], [1], [0, 0, 1, 1], [], []>} : vector<16x128xbf16>, vector<128x128xbf16>, vector<16x128xf32> -> vector<16x128xf32>
    %45 = vector.extract_strided_slice %15 {offsets = [80, 0], sizes = [16, 128], strides = [1, 1]} : vector<128x128xf32> to vector<16x128xf32>
    %46 = arith.addf %45, %44 : vector<16x128xf32>
    %47 = math.tanh %46 : vector<16x128xf32>
    %48 = arith.truncf %47 : vector<16x128xf32> to vector<16x128xbf16>
    %cst_19 = arith.constant dense<0.000000e+00> : vector<16x128xf32>
    %49 = tpu.matmul %48, %16, %cst_19 {dimension_numbers = #tpu.dot_dimension_numbers<[1], [0], [0], [1], [0, 0, 1, 1], [], []>} : vector<16x128xbf16>, vector<128x128xbf16>, vector<16x128xf32> -> vector<16x128xf32>
    %50 = vector.extract_strided_slice %15 {offsets = [96, 0], sizes = [16, 128], strides = [1, 1]} : vector<128x128xf32> to vector<16x128xf32>
    %51 = arith.addf %50, %49 : vector<16x128xf32>
    %52 = math.tanh %51 : vector<16x128xf32>
    %53 = arith.truncf %52 : vector<16x128xf32> to vector<16x128xbf16>
    %cst_20 = arith.constant dense<0.000000e+00> : vector<16x128xf32>
    %54 = tpu.matmul %53, %16, %cst_20 {dimension_numbers = #tpu.dot_dimension_numbers<[1], [0], [0], [1], [0, 0, 1, 1], [], []>} : vector<16x128xbf16>, vector<128x128xbf16>, vector<16x128xf32> -> vector<16x128xf32>
    %55 = vector.extract_strided_slice %15 {offsets = [112, 0], sizes = [16, 128], strides = [1, 1]} : vector<128x128xf32> to vector<16x128xf32>
    %56 = arith.addf %55, %54 : vector<16x128xf32>
    %57 = math.tanh %56 : vector<16x128xf32>
    %58 = arith.truncf %57 : vector<16x128xf32> to vector<16x128xbf16>
    %c0_21 = arith.constant 0 : index
    %c0_22 = arith.constant 0 : index
    %59 = vector.load %arg5[%c0_21, %c0_22] : memref<128x128xbf16, #tpu.memory_space<vmem>>, vector<128x128xbf16>
    %cst_23 = arith.constant dense<0.000000e+00> : vector<16x128xf32>
    %60 = tpu.matmul %58, %59, %cst_23 {dimension_numbers = #tpu.dot_dimension_numbers<[1], [0], [0], [1], [0, 0, 1, 1], [], []>} : vector<16x128xbf16>, vector<128x128xbf16>, vector<16x128xf32> -> vector<16x128xf32>
    %c0_24 = arith.constant 0 : index
    %c0_25 = arith.constant 0 : index
    %61 = vector.load %arg6[%c0_24, %c0_25] : memref<1x128xf32, #tpu.memory_space<vmem>>, vector<1x128xf32>
    %62 = vector.broadcast %61 : vector<1x128xf32> to vector<16x128xf32>
    %63 = arith.addf %60, %62 : vector<16x128xf32>
    %c0_26 = arith.constant 0 : index
    %c0_27 = arith.constant 0 : index
    %64 = vector.load %arg7[%c0_26, %c0_27] : memref<16x128xf32, #tpu.memory_space<vmem>>, vector<16x128xf32>
    tpu.vector_store %arg7[%c0_26, %c0_27], %63 {strides = array<i32>} : memref<16x128xf32, #tpu.memory_space<vmem>>, vector<16x128xf32>,
    return
  }
}

</mosaic_0001>

<bundles_post_ra>
// kernel: tpu_custom_call.1
= control target key start
LH: loop header
LB: loop body
LE: loop exit
PB: predicated region body
PF: predicated region fallthrough
CT: control target
= control target key end

     0   :  { %12 = vsyncpa [#allocation3], 0  ;;  %s1312_s0 = inlined_call_operand.vmem [shape: s32[128,1], index: 0, kind: input, shape index: {}]   ;;  %s1313_s1 = inlined_call_operand.vmem [shape: bf16[128,128], index: 1, kind: input, shape index: {}]   ;;  %s1314_s2 = inlined_call_operand.vmem [shape: bf16[128,128], index: 2, kind: input, shape index: {}]   ;;  %s1315_s3 = inlined_call_operand.vmem [shape: f32[1,128], index: 3, kind: input, shape index: {}]   ;;  %s1316_s4 = inlined_call_operand.hbm [shape: bf16[128,128], index: 4, kind: input, shape index: {}]   ;;  %s1317_s5 = inlined_call_operand.hbm [shape: bf16[128,128], index: 5, kind: input, shape index: {}]   ;;  %s1318_s6 = inlined_call_operand.vmem [shape: f32[1,128], index: 6, kind: input, shape index: {}]   ;;  %s1319_s7 = inlined_call_operand.hbm [shape: f32[16,128], index: 7, kind: output, shape index: {}]  }
   0x1   :  { %13 = vsyncpa [#allocation6], 0 }
   0x2   :  { %14 = vsyncpa [#allocation4], 0  ;;  %s27_s26 = sshll.u32 %s1316_s4, 4  ;;  %s1024_s27 = smov [#allocation2]   ;;  %s28_s26 = int_to_ptr.hbm [resolvable:$true] %s27_s26 }
   0x3   :  { %s29_s28 = sshll.u32 %s1024_s27, 4  ;;  %s40_s8 = sshll.u32 %s1317_s5, 4  ;;  %s30_s28 = int_to_ptr.vmem [resolvable:$true] %s29_s28  ;;  %s41_s8 = int_to_ptr.hbm [resolvable:$true] %s40_s8 }
   0x4   :  { %s1025_s9 = smov 64   ;;  %s1026_s10 = smov 4  }
   0x5   :  { %35 = dma.hbm_to_vmem [thread:$0]  %s28_s26, 1024, %s30_s28, [#allocation3], %s1025_s9, %s1025_s9, %s1026_s10  }
   0x6   :  { %s1027_s11 = smov [#allocation5]  }
   0x7   :  { %s42_s12 = sshll.u32 %s1027_s11, 4  ;;  %s43_s12 = int_to_ptr.vmem [resolvable:$true] %s42_s12 }
   0x8   :  { %48 = dma.hbm_to_vmem [thread:$0]  %s41_s8, 1024, %s43_s12, [#allocation6], %s1025_s9, %s1025_s9, %s1026_s10  }
   0x9   :  { %1018 = dma.done.wait [#allocation3], 1024  }
   0xa   :  { %1019 = vsyncadd [#allocation3], 4294966272 }
   0xb   :  { %1020 = dma.done.wait [#allocation6], 1024  }
   0xc   :  { %1021 = vsyncadd [#allocation6], 4294966272  ;;  %v1028_v0 = vmov 0   ;;  %v62_v1 = vld [vmem:[%s1312_s0 + $0x10] sm:$0xff]  ;;  %v60_v2 = vld [vmem:[%s1312_s0] sm:$0xff]  ;;  %v76_v26 = vlaneseq  ;;  %s1030_s25 = smov [#allocation7]  }
   0xd   :  { %910 = vset.pattern.permute.xlu1 %v1028_v0  ;;  %909 = vset.pattern.permute.xlu0 %v1028_v0  ;;  %v64_v3 = vld [vmem:[%s1312_s0 + $0x20] sm:$0xff]  ;;  %v63_v4 = vld [vmem:[%s1312_s0 + $0x18] sm:$0xff]  ;;  %v61_v5 = vld [vmem:[%s1312_s0 + $0x8] sm:$0xff]  ;;  %v1029_v30 = vmov 1.0|1.0   ;;  %s708_s26 = sshll.u32 %s1030_s25, 4  ;;  %s709_s26 = int_to_ptr.vmem [resolvable:$true] %s708_s26 }
   0xe   :  { %911 = vset.pattern.permute.xlu2 %v1028_v0  ;;  %85 = vperm.xlu1 %910, %v62_v1   ;;  %v65_v6 = vld [vmem:[%s1312_s0 + $0x28] sm:$0xff]  ;;  %v875_v7 = vld [vmem:[%s1313_s1 + $0x38] sm:$0xff]  ;;  %v874_v8 = vld [vmem:[%s1313_s1 + $0x30] sm:$0xff]  ;;  %v1154_v27 = vand.u32 127, %v76_v26  ;;  %s710_s29 = sshll.u32 %s1319_s7, 4  ;;  %s1031_s30 = smov 128   ;;  %s711_s29 = int_to_ptr.hbm [resolvable:$true] %s710_s29 }
   0xf   :  { %79 = vperm.xlu0 %909, %v60_v2   ;;  %91 = vperm.xlu2 %911, %v64_v3   ;;  %v67_v9 = vld [vmem:[%s1312_s0 + $0x38] sm:$0xff]  ;;  %v66_v10 = vld [vmem:[%s1312_s0 + $0x30] sm:$0xff]  ;;  %v68_v11 = vld [vmem:[%s1312_s0 + $0x40] sm:$0xff]  ;;  %s1032_s8 = smov 8  }
  0x10   :  { %230 = vmatpush.bf16.msra.mxu0 %v875_v7  ;;  %v873_v12 = vld [vmem:[%s1313_s1 + $0x28] sm:$0xff]  ;;  %v872_v13 = vld [vmem:[%s1313_s1 + $0x20] sm:$0xff]  ;;  %v70_v14 = vld [vmem:[%s1312_s0 + $0x50] sm:$0xff] }
  0x11   :  { %v69_v15 = vld [vmem:[%s1312_s0 + $0x48] sm:$0xff]  ;;  %v71_v16 = vld [vmem:[%s1312_s0 + $0x58] sm:$0xff]  ;;  %v870_v18 = vld [vmem:[%s1313_s1 + $0x10] sm:$0xff] }
  0x12   :  { %v871_v17 = vld [vmem:[%s1313_s1 + $0x18] sm:$0xff]  ;;  %v73_v19 = vld [vmem:[%s1312_s0 + $0x68] sm:$0xff]  ;;  %v72_v20 = vld [vmem:[%s1312_s0 + $0x60] sm:$0xff] }
  0x13   :  { %v74_v21 = vld [vmem:[%s1312_s0 + $0x70] sm:$0xff]  ;;  %v75_v22 = vld [vmem:[%s1312_s0 + $0x78] sm:$0xff]  ;;  %v869_v23 = vld [vmem:[%s1313_s1 + $0x8] sm:$0xff] }
  0x14   :  { %231 = vmatpush.bf16.msra.mxu0 %v874_v8  ;;  %v868_v24 = vld [vmem:[%s1313_s1] sm:$0xff]  ;;  %v1168_v36 = vld [vmem:[#allocation2 + $0x38] sm:$0xff]  ;;  %v1174_v39 = vld [vmem:[#allocation2 + $0x30] sm:$0xff] }
  0x15   :  { %468 = vmatpush.bf16.msra.mxu2 %v1168_v36  ;;  %487 = vmatpush.bf16.msra.mxu3 %v1168_v36  ;;  %v883_v40 = vld [vmem:[%s1314_s2 + $0x38] sm:$0xff]  ;;  %v1181_v41 = vld [vmem:[#allocation2 + $0x28] sm:$0xff]  ;;  %v882_v42 = vld [vmem:[%s1314_s2 + $0x30] sm:$0xff] }
  0x16   :  { %88 = vperm.xlu1 %910, %v63_v4   ;;  %355 = vmatpush.bf16.msra.mxu1 %v883_v40  ;;  %v1188_v43 = vld [vmem:[#allocation2 + $0x20] sm:$0xff]  ;;  %v1192_v46 = vld [vmem:[#allocation2 + $0x18] sm:$0xff]  ;;  %v881_v47 = vld [vmem:[%s1314_s2 + $0x28] sm:$0xff] }
  0x17   :  { %82 = vperm.xlu0 %909, %v61_v5   ;;  %94 = vperm.xlu2 %911, %v65_v6   ;;  %v1202_v48 = vld [vmem:[#allocation2 + $0x10] sm:$0xff]  ;;  %v880_v49 = vld [vmem:[%s1314_s2 + $0x20] sm:$0xff]  ;;  %v1209_v50 = vld [vmem:[#allocation2 + $0x8] sm:$0xff] }
  0x18   :  { %232 = vmatpush.bf16.msra.mxu0 %v873_v12  ;;  %v879_v51 = vld [vmem:[%s1314_s2 + $0x18] sm:$0xff]  ;;  %v1216_v52 = vld [vmem:[#allocation2] sm:$0xff]  ;;  %v878_v55 = vld [vmem:[%s1314_s2 + $0x10] sm:$0xff] }
  0x19   :  { %469 = vmatpush.bf16.msra.mxu2 %v1174_v39  ;;  %488 = vmatpush.bf16.msra.mxu3 %v1174_v39  ;;  %v877_v56 = vld [vmem:[%s1314_s2 + $0x8] sm:$0xff]  ;;  %v876_v57 = vld [vmem:[%s1314_s2] sm:$0xff] }
  0x1a   :  { %356 = vmatpush.bf16.msra.mxu1 %v882_v42 }
  0x1c   :  { %233 = vmatpush.bf16.msra.mxu0 %v872_v13 }
  0x1d   :  { %470 = vmatpush.bf16.msra.mxu2 %v1181_v41  ;;  %489 = vmatpush.bf16.msra.mxu3 %v1181_v41 }
  0x1e   :  { %100 = vperm.xlu1 %910, %v67_v9   ;;  %357 = vmatpush.bf16.msra.mxu1 %v881_v47 }
  0x1f   :  { %97 = vperm.xlu0 %909, %v66_v10   ;;  %103 = vperm.xlu2 %911, %v68_v11  }
  0x20   :  { %234 = vmatpush.bf16.msra.mxu0 %v871_v17 }
  0x21   :  { %471 = vmatpush.bf16.msra.mxu2 %v1188_v43  ;;  %490 = vmatpush.bf16.msra.mxu3 %v1188_v43 }
  0x22   :  { %358 = vmatpush.bf16.msra.mxu1 %v880_v49 }
  0x24   :  { %235 = vmatpush.bf16.msra.mxu0 %v870_v18 }
  0x25   :  { %472 = vmatpush.bf16.msra.mxu2 %v1192_v46  ;;  %491 = vmatpush.bf16.msra.mxu3 %v1192_v46 }
  0x26   :  { %109 = vperm.xlu1 %910, %v70_v14   ;;  %359 = vmatpush.bf16.msra.mxu1 %v879_v51 }
  0x27   :  { %106 = vperm.xlu0 %909, %v69_v15   ;;  %112 = vperm.xlu2 %911, %v71_v16  }
  0x28   :  { %236 = vmatpush.bf16.msra.mxu0 %v869_v23 }
  0x29   :  { %473 = vmatpush.bf16.msra.mxu2 %v1202_v48  ;;  %492 = vmatpush.bf16.msra.mxu3 %v1202_v48 }
  0x2a   :  { %360 = vmatpush.bf16.msra.mxu1 %v878_v55 }
  0x2c   :  { %237 = vmatpush.bf16.msra.mxu0 %v868_v24 }
  0x2d   :  { %474 = vmatpush.bf16.msra.mxu2 %v1209_v50  ;;  %493 = vmatpush.bf16.msra.mxu3 %v1209_v50 }
  0x2e   :  { %118 = vperm.xlu1 %910, %v73_v19   ;;  %361 = vmatpush.bf16.msra.mxu1 %v877_v56 }
  0x2f   :  { %115 = vperm.xlu0 %909, %v72_v20   ;;  %121 = vperm.xlu2 %911, %v74_v21   ;;  %v1264_v21 = vld [vmem:[%s1315_s3] ss:$0 sm:$0xff] }
  0x31   :  { %475 = vmatpush.bf16.msra.mxu2 %v1216_v52  ;;  %494 = vmatpush.bf16.msra.mxu3 %v1216_v52 }
  0x32   :  { %362 = vmatpush.bf16.msra.mxu1 %v876_v57 }
  0x34   :  { %476 = vmatmul.bf16.vlgmr.msra.gmra.mxu2 %v1028_v0 }
  0x35   :  { %506 = vmatpush.bf16.msrb.mxu2 %v1168_v36  ;;  %525 = vmatpush.bf16.msrb.mxu3 %v1168_v36 }
  0x37   :  { %124 = vperm.xlu0 %909, %v75_v22  }
  0x39   :  { %507 = vmatpush.bf16.msrb.mxu2 %v1174_v39  ;;  %526 = vmatpush.bf16.msrb.mxu3 %v1174_v39 }
  0x3d   :  { %508 = vmatpush.bf16.msrb.mxu2 %v1181_v41  ;;  %527 = vmatpush.bf16.msrb.mxu3 %v1181_v41 }
  0x41   :  { %509 = vmatpush.bf16.msrb.mxu2 %v1188_v43  ;;  %528 = vmatpush.bf16.msrb.mxu3 %v1188_v43 }
  0x45   :  { %510 = vmatpush.bf16.msrb.mxu2 %v1192_v46  ;;  %529 = vmatpush.bf16.msrb.mxu3 %v1192_v46 }
  0x49   :  { %511 = vmatpush.bf16.msrb.mxu2 %v1202_v48  ;;  %530 = vmatpush.bf16.msrb.mxu3 %v1202_v48 }
  0x4d   :  { %512 = vmatpush.bf16.msrb.mxu2 %v1209_v50  ;;  %531 = vmatpush.bf16.msrb.mxu3 %v1209_v50 }
  0x51   :  { %513 = vmatpush.bf16.msrb.mxu2 %v1216_v52  ;;  %532 = vmatpush.bf16.msrb.mxu3 %v1216_v52 }
  0x55   :  { %544 = vmatpush.bf16.msra.mxu2 %v1168_v36 }
  0x59   :  { %545 = vmatpush.bf16.msra.mxu2 %v1174_v39 }
  0x5d   :  { %546 = vmatpush.bf16.msra.mxu2 %v1181_v41 }
  0x61   :  { %547 = vmatpush.bf16.msra.mxu2 %v1188_v43 }
  0x65   :  { %548 = vmatpush.bf16.msra.mxu2 %v1192_v46 }
  0x69   :  { %v92_v32 = vpop.permute.xlu2 %91  ;;  %549 = vmatpush.bf16.msra.mxu2 %v1202_v48 }
  0x6a   :  { %vm130_vm6 = vcmp.eq.s32.totalorder %v1154_v27, %v92_v32 }
  0x6d   :  { %550 = vmatpush.bf16.msra.mxu2 %v1209_v50 }
  0x71   :  { %v95_v33 = vpop.permute.xlu2 %94  ;;  %551 = vmatpush.bf16.msra.mxu2 %v1216_v52 }
  0x72   :  { %vm131_vm7 = vcmp.eq.s32.totalorder %v1154_v27, %v95_v33 }
  0x73   :  { %vm760_vm8 = vmpackc.low %vm131_vm7, %vm130_vm6 }
  0x79   :  { %v104_v37 = vpop.permute.xlu2 %103 }
  0x7a   :  { %vm134_vm12 = vcmp.eq.s32.totalorder %v1154_v27, %v104_v37 }
  0x80   :  { %v86_v29 = vpop.permute.xlu1 %85 }
  0x81   :  { %v80_v25 = vpop.permute.xlu0 %79  ;;  %vm128_vm3 = vcmp.eq.s32.totalorder %v1154_v27, %v86_v29  ;;  %v113_v45 = vpop.permute.xlu2 %112 }
  0x82   :  { %vm126_vm1 = vcmp.eq.s32.totalorder %v1154_v27, %v80_v25 }
  0x88   :  { %v89_v31 = vpop.permute.xlu1 %88 }
  0x89   :  { %v83_v28 = vpop.permute.xlu0 %82  ;;  %vm129_vm4 = vcmp.eq.s32.totalorder %v1154_v27, %v89_v31  ;;  %v122_v58 = vpop.permute.xlu2 %121 }
  0x8a   :  { %vm127_vm0 = vcmp.eq.s32.totalorder %v1154_v27, %v83_v28  ;;  %vm758_vm5 = vmpackc.low %vm129_vm4, %vm128_vm3 }
  0x8b   :  { %vm756_vm2 = vmpackc.low %vm127_vm0, %vm126_vm1  ;;  %vm137_vm0 = vcmp.eq.s32.totalorder %v1154_v27, %v113_v45 }
  0x8c   :  { %757 = vmatmul.msk.bf16.vlgmr.msra.gmra.mxu0 %vm756_vm2, %v1029_v30 }
  0x90   :  { %v101_v34 = vpop.permute.xlu1 %100 }
  0x91   :  { %v98_v35 = vpop.permute.xlu0 %97  ;;  %vm133_vm9 = vcmp.eq.s32.totalorder %v1154_v27, %v101_v34 }
  0x92   :  { %vm132_vm10 = vcmp.eq.s32.totalorder %v1154_v27, %v98_v35 }
  0x93   :  { %vm762_vm11 = vmpackc.low %vm133_vm9, %vm132_vm10 }
  0x98   :  { %v110_v44 = vpop.permute.xlu1 %109 }
  0x99   :  { %v107_v38 = vpop.permute.xlu0 %106  ;;  %vm136_vm15 = vcmp.eq.s32.totalorder %v1154_v27, %v110_v44 }
  0x9a   :  { %vm135_vm13 = vcmp.eq.s32.totalorder %v1154_v27, %v107_v38  ;;  %vm766_vm1 = vmpackc.low %vm137_vm0, %vm136_vm15 }
  0x9b   :  { %vm764_vm14 = vmpackc.low %vm135_vm13, %vm134_vm12 }
  0x9c   :  { %759 = vmatmul.msk.bf16.gmra.mxu0 %vm758_vm5, %v1029_v30  ;;  %vm140_vm5 = vcmp.eq.s32.totalorder %v1154_v27, %v122_v58 }
  0xa0   :  { %v119_v53 = vpop.permute.xlu1 %118 }
  0xa1   :  { %v116_v54 = vpop.permute.xlu0 %115  ;;  %vm139_vm2 = vcmp.eq.s32.totalorder %v1154_v27, %v119_v53 }
  0xa2   :  { %vm138_vm3 = vcmp.eq.s32.totalorder %v1154_v27, %v116_v54 }
  0xa3   :  { %vm768_vm4 = vmpackc.low %vm139_vm2, %vm138_vm3 }
  0xa9   :  { %v125_v59 = vpop.permute.xlu0 %124 }
  0xaa   :  { %vm141_vm6 = vcmp.eq.s32.totalorder %v1154_v27, %v125_v59 }
  0xab   :  { %vm770_vm7 = vmpackc.low %vm141_vm6, %vm140_vm5 }
  0xac   :  { %761 = vmatmul.msk.bf16.gmra.mxu0 %vm760_vm8, %v1029_v30 }
  0xb7   :  { %v477_v20 = vpop.f32.mrf.mxu2 }
  0xbc   :  { %763 = vmatmul.msk.bf16.gmra.mxu0 %vm762_vm11, %v1029_v30 }
  0xbf   :  { %v479_v27 = vpop.f32.mrf.mxu2 }
  0xcc   :  { %765 = vmatmul.msk.bf16.gmra.mxu0 %vm764_vm14, %v1029_v30 }
  0xdc   :  { %767 = vmatmul.msk.bf16.gmra.mxu0 %vm766_vm1, %v1029_v30 }
  0xec   :  { %769 = vmatmul.msk.bf16.gmra.mxu0 %vm768_vm4, %v1029_v30 }
  0xfc   :  { %771 = vmatmul.msk.bf16.gmra.mxu0 %vm770_vm7, %v1029_v30 }
 0x109   :  { %v239_v60 = vpop.f32.mrf.mxu0 }
 0x111   :  { %v241_v61 = vpop.f32.mrf.mxu0 }
 0x112   :  { %v279_v62 = vpack.c.bf16 %v241_v61, %v239_v60 }
 0x114   :  { %363 = vmatmul.bf16.vlgmr.msra.gmra.mxu1 %v279_v62 }
 0x119   :  { %v244_v63 = vpop.f32.mrf.mxu0 }
 0x121   :  { %v246_v0 = vpop.f32.mrf.mxu0 }
 0x122   :  { %v280_v1 = vpack.c.bf16 %v246_v0, %v244_v63 }
 0x124   :  { %368 = vmatmul.bf16.gmra.mxu1 %v280_v1 }
 0x129   :  { %v249_v2 = vpop.f32.mrf.mxu0 }
 0x131   :  { %v251_v3 = vpop.f32.mrf.mxu0 }
 0x132   :  { %v281_v4 = vpack.c.bf16 %v251_v3, %v249_v2 }
 0x134   :  { %373 = vmatmul.bf16.gmra.mxu1 %v281_v4 }
 0x139   :  { %v254_v5 = vpop.f32.mrf.mxu0 }
 0x141   :  { %v256_v6 = vpop.f32.mrf.mxu0 }
 0x142   :  { %v282_v7 = vpack.c.bf16 %v256_v6, %v254_v5 }
 0x144   :  { %378 = vmatmul.bf16.gmra.mxu1 %v282_v7 }
 0x149   :  { %v259_v8 = vpop.f32.mrf.mxu0 }
 0x151   :  { %v261_v9 = vpop.f32.mrf.mxu0 }
 0x152   :  { %v283_v10 = vpack.c.bf16 %v261_v9, %v259_v8 }
 0x154   :  { %383 = vmatmul.bf16.gmra.mxu1 %v283_v10 }
 0x159   :  { %v264_v11 = vpop.f32.mrf.mxu0 }
 0x161   :  { %v266_v12 = vpop.f32.mrf.mxu0 }
 0x162   :  { %v284_v13 = vpack.c.bf16 %v266_v12, %v264_v11 }
 0x164   :  { %388 = vmatmul.bf16.gmra.mxu1 %v284_v13 }
 0x169   :  { %v269_v14 = vpop.f32.mrf.mxu0 }
 0x171   :  { %v271_v15 = vpop.f32.mrf.mxu0 }
 0x172   :  { %v285_v16 = vpack.c.bf16 %v271_v15, %v269_v14 }
 0x174   :  { %393 = vmatmul.bf16.gmra.mxu1 %v285_v16 }
 0x179   :  { %v274_v17 = vpop.f32.mrf.mxu0 }
 0x181   :  { %v276_v18 = vpop.f32.mrf.mxu0 }
 0x182   :  { %v286_v19 = vpack.c.bf16 %v276_v18, %v274_v17 }
 0x184   :  { %398 = vmatmul.bf16.gmra.mxu1 %v286_v19 }
 0x191   :  { %v364_v22 = vpop.f32.mrf.mxu1 }
 0x192   :  { %v365_v23 = vadd.f32 %v1264_v21, %v364_v22 }
 0x194   :  { %v482_v24 = vadd.f32 %v477_v20, %v365_v23 }
 0x196   :  { %914 = vtanh.f32 %v482_v24  ;;  %v899_v24 = vld [vmem:[#allocation5 + $0x38] sm:$0xff] }
 0x197   :  { %688 = vmatpush.bf16.msrb.mxu0 %v899_v24 }
 0x199   :  { %v366_v25 = vpop.f32.mrf.mxu1 }
 0x19a   :  { %v367_v26 = vadd.f32 %v1264_v21, %v366_v25  ;;  %v898_v25 = vld [vmem:[#allocation5 + $0x30] sm:$0xff] }
 0x19b   :  { %689 = vmatpush.bf16.msrb.mxu0 %v898_v25 }
 0x19c   :  { %v483_v28 = vadd.f32 %v479_v27, %v367_v26  ;;  %v915_v29 = vpop.eup %914  ;;  %v897_v27 = vld [vmem:[#allocation5 + $0x28] sm:$0xff] }
 0x19e   :  { %916 = vtanh.f32 %v483_v28  ;;  %v896_v28 = vld [vmem:[#allocation5 + $0x20] sm:$0xff] }
 0x19f   :  { %690 = vmatpush.bf16.msrb.mxu0 %v897_v27 }
 0x1a1   :  { %v369_v32 = vpop.f32.mrf.mxu1 }
 0x1a2   :  { %v370_v34 = vadd.f32 %v1264_v21, %v369_v32 }
 0x1a3   :  { %691 = vmatpush.bf16.msrb.mxu0 %v896_v28 }
 0x1a4   :  { %v917_v30 = vpop.eup %916 }
 0x1a5   :  { %v486_v31 = vpack.c.bf16 %v917_v30, %v915_v29  ;;  %v895_v30 = vld [vmem:[#allocation5 + $0x18] sm:$0xff] }
 0x1a7   :  { %495 = vmatmul.bf16.vlgmr.msra.gmra.mxu3 %v486_v31  ;;  %692 = vmatpush.bf16.msrb.mxu0 %v895_v30 }
 0x1a8   :  { %563 = vmatpush.bf16.msra.mxu3 %v1168_v36 }
 0x1a9   :  { %v371_v35 = vpop.f32.mrf.mxu1 }
 0x1aa   :  { %v372_v38 = vadd.f32 %v1264_v21, %v371_v35 }
 0x1ac   :  { %564 = vmatpush.bf16.msra.mxu3 %v1174_v39 }
 0x1b0   :  { %565 = vmatpush.bf16.msra.mxu3 %v1181_v41 }
 0x1b1   :  { %v374_v49 = vpop.f32.mrf.mxu1 }
 0x1b2   :  { %v375_v53 = vadd.f32 %v1264_v21, %v374_v49 }
 0x1b4   :  { %566 = vmatpush.bf16.msra.mxu3 %v1188_v43 }
 0x1b8   :  { %567 = vmatpush.bf16.msra.mxu3 %v1192_v46 }
 0x1b9   :  { %v376_v54 = vpop.f32.mrf.mxu1 }
 0x1ba   :  { %v377_v56 = vadd.f32 %v1264_v21, %v376_v54 }
 0x1bc   :  { %568 = vmatpush.bf16.msra.mxu3 %v1202_v48 }
 0x1c0   :  { %569 = vmatpush.bf16.msra.mxu3 %v1209_v50 }
 0x1c1   :  { %v379_v62 = vpop.f32.mrf.mxu1 }
 0x1c2   :  { %v380_v0 = vadd.f32 %v1264_v21, %v379_v62  ;;  %v913_v62 = vld [vmem:[%s1318_s6] ss:$0 sm:$0xff] }
 0x1c4   :  { %570 = vmatpush.bf16.msra.mxu3 %v1216_v52 }
 0x1c9   :  { %v381_v1 = vpop.f32.mrf.mxu1 }
 0x22a   :  { %v496_v33 = vpop.f32.mrf.mxu3 }
 0x22b   :  { %v501_v37 = vadd.f32 %v496_v33, %v370_v34  ;;  %v894_v34 = vld [vmem:[#allocation5 + $0x10] sm:$0xff] }
 0x22c   :  { %693 = vmatpush.bf16.msrb.mxu0 %v894_v34 }
 0x22d   :  { %918 = vtanh.f32 %v501_v37 }
 0x232   :  { %v498_v40 = vpop.f32.mrf.mxu3 }
 0x233   :  { %v502_v42 = vadd.f32 %v498_v40, %v372_v38  ;;  %v919_v44 = vpop.eup %918  ;;  %v893_v40 = vld [vmem:[#allocation5 + $0x8] sm:$0xff] }
 0x234   :  { %694 = vmatpush.bf16.msrb.mxu0 %v893_v40 }
 0x235   :  { %920 = vtanh.f32 %v502_v42 }
 0x23b   :  { %v921_v45 = vpop.eup %920 }
 0x23c   :  { %v505_v47 = vpack.c.bf16 %v921_v45, %v919_v44 }
 0x23e   :  { %514 = vmatmul.bf16.vlgmr.msrb.gmra.mxu2 %v505_v47  ;;  %v892_v47 = vld [vmem:[#allocation5] sm:$0xff] }
 0x23f   :  { %582 = vmatpush.bf16.msrb.mxu2 %v1168_v36  ;;  %695 = vmatpush.bf16.msrb.mxu0 %v892_v47 }
 0x243   :  { %583 = vmatpush.bf16.msrb.mxu2 %v1174_v39 }
 0x247   :  { %584 = vmatpush.bf16.msrb.mxu2 %v1181_v41 }
 0x24b   :  { %585 = vmatpush.bf16.msrb.mxu2 %v1188_v43 }
 0x24f   :  { %586 = vmatpush.bf16.msrb.mxu2 %v1192_v46 }
 0x253   :  { %587 = vmatpush.bf16.msrb.mxu2 %v1202_v48 }
 0x257   :  { %588 = vmatpush.bf16.msrb.mxu2 %v1209_v50 }
 0x25b   :  { %589 = vmatpush.bf16.msrb.mxu2 %v1216_v52 }
 0x2c1   :  { %v515_v51 = vpop.f32.mrf.mxu2 }
 0x2c2   :  { %v520_v55 = vadd.f32 %v515_v51, %v375_v53 }
 0x2c4   :  { %922 = vtanh.f32 %v520_v55 }
 0x2c9   :  { %v517_v57 = vpop.f32.mrf.mxu2 }
 0x2ca   :  { %v521_v58 = vadd.f32 %v517_v57, %v377_v56  ;;  %v923_v59 = vpop.eup %922 }
 0x2cc   :  { %924 = vtanh.f32 %v521_v58 }
 0x2d2   :  { %v925_v60 = vpop.eup %924 }
 0x2d3   :  { %v524_v61 = vpack.c.bf16 %v925_v60, %v923_v59 }
 0x2d5   :  { %533 = vmatmul.bf16.vlgmr.msrb.gmra.mxu3 %v524_v61 }
 0x2d6   :  { %601 = vmatpush.bf16.msrb.mxu3 %v1168_v36 }
 0x2da   :  { %602 = vmatpush.bf16.msrb.mxu3 %v1174_v39  ;;  %v382_v39 = vadd.f32 %v1264_v21, %v381_v1 }
 0x2de   :  { %603 = vmatpush.bf16.msrb.mxu3 %v1181_v41 }
 0x2e2   :  { %604 = vmatpush.bf16.msrb.mxu3 %v1188_v43 }
 0x2e6   :  { %605 = vmatpush.bf16.msrb.mxu3 %v1192_v46 }
 0x2ea   :  { %606 = vmatpush.bf16.msrb.mxu3 %v1202_v48  ;;  %v384_v48 = vpop.f32.mrf.mxu1 }
 0x2ee   :  { %607 = vmatpush.bf16.msrb.mxu3 %v1209_v50 }
 0x2f2   :  { %608 = vmatpush.bf16.msrb.mxu3 %v1216_v52  ;;  %v385_v52 = vadd.f32 %v1264_v21, %v384_v48  ;;  %v386_v4 = vpop.f32.mrf.mxu1 }
 0x2f3   :  { %v387_v6 = vadd.f32 %v1264_v21, %v386_v4 }
 0x2fa   :  { %v389_v12 = vpop.f32.mrf.mxu1 }
 0x2fb   :  { %v390_v14 = vadd.f32 %v1264_v21, %v389_v12 }
 0x302   :  { %v391_v15 = vpop.f32.mrf.mxu1 }
 0x303   :  { %v392_v17 = vadd.f32 %v1264_v21, %v391_v15 }
 0x30a   :  { %v394_v26 = vpop.f32.mrf.mxu1 }
 0x30b   :  { %v395_v31 = vadd.f32 %v1264_v21, %v394_v26 }
 0x312   :  { %v396_v32 = vpop.f32.mrf.mxu1 }
 0x313   :  { %v397_v35 = vadd.f32 %v1264_v21, %v396_v32 }
 0x31a   :  { %v399_v49 = vpop.f32.mrf.mxu1 }
 0x31b   :  { %v400_v53 = vadd.f32 %v1264_v21, %v399_v49 }
 0x322   :  { %v401_v54 = vpop.f32.mrf.mxu1 }
 0x323   :  { %v402_v56 = vadd.f32 %v1264_v21, %v401_v54 }
 0x358   :  { %v534_v63 = vpop.f32.mrf.mxu3 }
 0x359   :  { %v539_v36 = vadd.f32 %v534_v63, %v380_v0 }
 0x35b   :  { %926 = vtanh.f32 %v539_v36 }
 0x360   :  { %v536_v2 = vpop.f32.mrf.mxu3 }
 0x361   :  { %v540_v41 = vadd.f32 %v536_v2, %v382_v39  ;;  %v927_v43 = vpop.eup %926 }
 0x363   :  { %928 = vtanh.f32 %v540_v41 }
 0x369   :  { %v929_v46 = vpop.eup %928 }
 0x36a   :  { %v543_v3 = vpack.c.bf16 %v929_v46, %v927_v43 }
 0x36c   :  { %552 = vmatmul.bf16.vlgmr.msra.gmra.mxu2 %v543_v3 }
 0x3ef   :  { %v553_v50 = vpop.f32.mrf.mxu2 }
 0x3f0   :  { %v558_v5 = vadd.f32 %v553_v50, %v385_v52 }
 0x3f2   :  { %930 = vtanh.f32 %v558_v5 }
 0x3f7   :  { %v555_v7 = vpop.f32.mrf.mxu2 }
 0x3f8   :  { %v559_v8 = vadd.f32 %v555_v7, %v387_v6  ;;  %v931_v9 = vpop.eup %930 }
 0x3fa   :  { %932 = vtanh.f32 %v559_v8 }
 0x400   :  { %v933_v10 = vpop.eup %932 }
 0x401   :  { %v562_v11 = vpack.c.bf16 %v933_v10, %v931_v9 }
 0x403   :  { %571 = vmatmul.bf16.vlgmr.msra.gmra.mxu3 %v562_v11 }
 0x486   :  { %v572_v13 = vpop.f32.mrf.mxu3 }
 0x487   :  { %v577_v16 = vadd.f32 %v572_v13, %v390_v14 }
 0x489   :  { %934 = vtanh.f32 %v577_v16 }
 0x48e   :  { %v574_v18 = vpop.f32.mrf.mxu3 }
 0x48f   :  { %v578_v19 = vadd.f32 %v574_v18, %v392_v17  ;;  %v935_v20 = vpop.eup %934 }
 0x491   :  { %936 = vtanh.f32 %v578_v19 }
 0x497   :  { %v937_v22 = vpop.eup %936 }
 0x498   :  { %v581_v23 = vpack.c.bf16 %v937_v22, %v935_v20 }
 0x49a   :  { %590 = vmatmul.bf16.vlgmr.msrb.gmra.mxu2 %v581_v23 }
 0x51d   :  { %v591_v29 = vpop.f32.mrf.mxu2 }
 0x51e   :  { %v596_v33 = vadd.f32 %v591_v29, %v395_v31 }
 0x520   :  { %938 = vtanh.f32 %v596_v33 }
 0x525   :  { %v593_v37 = vpop.f32.mrf.mxu2 }
 0x526   :  { %v597_v38 = vadd.f32 %v593_v37, %v397_v35  ;;  %v939_v42 = vpop.eup %938 }
 0x528   :  { %940 = vtanh.f32 %v597_v38 }
 0x52e   :  { %v941_v44 = vpop.eup %940 }
 0x52f   :  { %v600_v45 = vpack.c.bf16 %v941_v44, %v939_v42 }
 0x531   :  { %609 = vmatmul.bf16.vlgmr.msrb.gmra.mxu3 %v600_v45 }
 0x5b4   :  { %v610_v51 = vpop.f32.mrf.mxu3 }
 0x5b5   :  { %v615_v55 = vadd.f32 %v610_v51, %v400_v53 }
 0x5b7   :  { %942 = vtanh.f32 %v615_v55 }
 0x5bc   :  { %v612_v57 = vpop.f32.mrf.mxu3 }
 0x5bd   :  { %v616_v58 = vadd.f32 %v612_v57, %v402_v56  ;;  %v943_v59 = vpop.eup %942 }
 0x5bf   :  { %944 = vtanh.f32 %v616_v58 }
 0x5c5   :  { %v945_v60 = vpop.eup %944 }
 0x5c6   :  { %v619_v61 = vpack.c.bf16 %v945_v60, %v943_v59 }
 0x5c8   :  { %696 = vmatmul.bf16.vlgmr.msrb.gmra.mxu0 %v619_v61 }
 0x645   :  { %v697_v63 = vpop.f32.mrf.mxu0 }
 0x646   :  { %v698_v0 = vadd.f32 %v913_v62, %v697_v63 }
 0x648   :  { %702 = vst [vmem:[#allocation7] sm:$0xff] %v698_v0 }
 0x64d   :  { %v699_v21 = vpop.f32.mrf.mxu0 }
 0x64e   :  { %v700_v1 = vadd.f32 %v913_v62, %v699_v21 }
 0x650   :  { %703 = vst [vmem:[#allocation7 + $0x8] sm:$0xff] %v700_v1 }
 0x651   :  { %716 = dma.vmem_to_hbm [thread:$0]  %s709_s26, 256, %s711_s29, [#allocation4], %s1031_s30, %s1031_s30, %s1032_s8  }
 0x652   :  { %1022 = dma.done.wait [#allocation4], 256  }
 0x653   :  { %1023 = vsyncadd [#allocation4], 4294967040 }
 0x654   :  { %721 = vsyncpa [#allocation3], 1 }
 0x655   :  { %722 = vsyncpa [#allocation6], 1 }
 0x656   :  { %723 = vsyncpa [#allocation4], 1 }

</bundles_post_ra>
